<compile_context>
chip_gen: v7x
topology: tpu7x:2x2x1
jax: 0.10.0
libtpu: 0.0.40
codegen_flags: <defaults>
</compile_context>

<pallas_src>
from collections import defaultdict

import jax
import jax.numpy as jnp
import numpy as np
from jax.experimental import pallas as pl
from jax.experimental.pallas import tpu as pltpu


def _cdiv(a, b):
    return -(-a // b)


def _retile_lane_dense(x):
    """Zero-copy reshape to a lane-dense 2-D (rows, L) view.

    Only tiny inputs (<8 rows after retile) get a small zero-row pad up to 8
    sublanes; zero rows contribute 0 to sum|x|^p so the result is exact.
    """
    x = jnp.asarray(x)
    n = int(x.size)

    best = None       # largest lane width giving >= 8 rows
    fallback = None   # smallest dividing lane width (least tiny-pad)
    for lanes in (1024, 512, 256, 128):
        if n >= lanes and n % lanes == 0:
            if n // lanes >= 8 and best is None:
                best = lanes
            fallback = lanes
    chosen = best if best is not None else fallback

    if chosen is not None:
        x2 = jnp.reshape(x, (n // chosen, chosen))
    elif x.ndim >= 2:
        # Fallback: natural 2-D view (exact; just lane-padded inside vregs).
        x2 = jnp.reshape(x, (-1, x.shape[-1]))
    else:
        x2 = jnp.reshape(x, (1, n))

    rows = x2.shape[0]
    if rows < 8:
        x2 = jnp.pad(x2, ((0, 8 - rows), (0, 0)))   # tiny arrays only
    return x2


def _vmem_budget():
    """(scoped vmem_limit_bytes, per-tile byte cap) per TPU generation."""
    cap = 64 * 1024 * 1024
    try:
        info = pltpu.get_tpu_info()
        cap = int(getattr(info, "vmem_capacity_bytes", cap))
    except Exception:
        pass
    # ~90 MiB scoped limit on v5e/v6e (128 MiB physical), ~45 MiB on v7x (64 MiB).
    limit = min(int(cap * 0.70), 100 * 1024 * 1024)
    # v7x has the least VMEM but the most HBM bandwidth: cap tiles at 8 MiB there,
    # 16 MiB on v5e/v6e.
    tile_cap = 8 * 1024 * 1024 if cap <= 64 * 1024 * 1024 else 16 * 1024 * 1024
    return limit, tile_cap


def _make_group_kernel(num_emb, norm, rows, tm, lanes, chunk, kb, need_mask):
    """Kernel computing sum(|x|^norm) partials for `num_emb` same-shaped inputs."""
    fold = tm // chunk

    def kernel(*refs):
        x_refs = refs[:num_emb]
        out_refs = refs[num_emb:2 * num_emb]
        acc_refs = refs[2 * num_emb:3 * num_emb]

        p = pl.program_id(0)
        k = pl.program_id(1)

        @pl.when(k == 0)
        def _():
            for e in range(num_emb):
                acc_refs[e][...] = jnp.zeros_like(acc_refs[e])

        # Global row offset of this block, from the *unclamped* block index so
        # masking also squashes duplicated blocks of a ragged parallel split.
        block_row0 = (p * kb + k) * tm

        row_iota = None
        if need_mask:
            row_iota = jax.lax.broadcasted_iota(jnp.int32, (chunk, lanes), 0)

        for e in range(num_emb):
            x_ref = x_refs[e]

            def body(g, carry, x_ref=x_ref):
                off = pl.multiple_of(g * chunk, chunk)
                x = x_ref[pl.ds(off, chunk), :].astype(jnp.float32)
                if need_mask:
                    rid = block_row0 + off + row_iota
                    x = jnp.where(rid < rows, x, 0.0)
                if norm == 2:
                    contrib = x * x              # even power: no abs needed
                elif norm == 1:
                    contrib = jnp.abs(x)
                elif isinstance(norm, int) and norm > 0:
                    ax = jnp.abs(x)
                    contrib = ax
                    for _ in range(norm - 1):
                        contrib = contrib * ax
                else:
                    contrib = jnp.abs(x) ** float(norm)
                return carry + contrib

            partial = jax.lax.fori_loop(
                0, fold, body, jnp.zeros((chunk, lanes), jnp.float32))
            acc_refs[e][...] += partial          # one small acc touch per step

        @pl.when(k == kb - 1)
        def _():
            for e in range(num_emb):
                total = jnp.sum(acc_refs[e][...])
                out_refs[e][...] = jnp.full((1, 8, 128), total, jnp.float32)

    return kernel


def _group_sum_abs_pow(xs, norm):
    """sum(|x|^norm) for each same-shaped 2-D array in xs, via ONE pallas_call."""
    rows, lanes = xs[0].shape
    num_emb = len(xs)
    itemsize = jnp.dtype(xs[0].dtype).itemsize

    vmem_limit, tile_cap = _vmem_budget()
    # Double-buffered input tiles for every embedding must fit under the limit.
    tile_budget = min(tile_cap, max(1, int(vmem_limit * 0.85) // (2 * num_emb)))
    row_bytes = lanes * itemsize
    budget_rows = max(16, (tile_budget // row_bytes) // 16 * 16)

    tm = max(8, min(budget_rows, (rows // 8) * 8))        # always a multiple of 8
    chunk = 16 if (tm % 16 == 0 and lanes <= 1024) else 8  # tm % chunk == 0

    n_blocks = _cdiv(rows, tm)
    p_dim = 2 if n_blocks >= 2 else 1          # feed both TensorCores on v7x
    kb = _cdiv(n_blocks, p_dim)
    need_mask = (p_dim * kb * tm != rows)

    if p_dim * kb == n_blocks:
        def in_map(p, k):
            return (p * kb + k, 0)
    else:
        last_block = n_blocks - 1

        def in_map(p, k):
            # Clamp the DMA in-range; duplicated blocks are masked in-kernel.
            return (jnp.minimum(p * kb + k, last_block), 0)

    kernel = _make_group_kernel(num_emb, norm, rows, tm, lanes, chunk, kb,
                                need_mask)

    outs = pl.pallas_call(
        kernel,
        out_shape=[jax.ShapeDtypeStruct((p_dim, 8, 128), jnp.float32)
                   for _ in range(num_emb)],
        grid_spec=pltpu.PrefetchScalarGridSpec(
            num_scalar_prefetch=0,
            grid=(p_dim, kb),
            in_specs=[pl.BlockSpec((tm, lanes), in_map) for _ in range(num_emb)],
            out_specs=[pl.BlockSpec((1, 8, 128), lambda p, k: (p, 0, 0))
                       for _ in range(num_emb)],
            scratch_shapes=[pltpu.VMEM((chunk, lanes), jnp.float32)
                            for _ in range(num_emb)],
        ),
        compiler_params=pltpu.CompilerParams(
            dimension_semantics=("parallel", "arbitrary"),
            vmem_limit_bytes=int(vmem_limit),
        ),
    )(*xs)

    return [jnp.sum(o[:, 0, 0]) for o in outs]


def emb_loss(*embeddings, norm=2, require_pow=False):
    """Pallas-backed EmbLoss.forward."""
    tiled = [_retile_lane_dense(e) for e in embeddings]

    # Fuse identically-shaped embeddings into one kernel launch each
    # (typical BPR case: three (batch, D) tensors -> a single pallas_call).
    buckets = defaultdict(list)
    for idx, x2 in enumerate(tiled):
        buckets[(x2.shape, jnp.dtype(x2.dtype))].append(idx)

    sums = [None] * len(embeddings)
    for _, idxs in buckets.items():
        group_sums = _group_sum_abs_pow([tiled[i] for i in idxs], norm)
        for i, s in zip(idxs, group_sums):
            sums[i] = s

    total = jnp.float32(0.0)
    for s in sums:
        if require_pow:
            term = s
        elif norm == 2:
            term = jnp.sqrt(s)
        else:
            term = s ** (1.0 / float(norm))
        total = total + term

    batch = embeddings[-1].shape[0]
    total = total / jnp.float32(batch)
    if require_pow:
        total = total / jnp.float32(norm)
    return jnp.reshape(total, (1,))


def emb_loss_ref(*embeddings, norm=2, require_pow=False):
    """Pure-JAX reference mirroring the PyTorch module."""
    total = jnp.float32(0.0)
    for e in embeddings:
        s = jnp.sum(jnp.abs(e.astype(jnp.float32)) ** norm)
        total = total + (s if require_pow else s ** (1.0 / norm))
    total = total / embeddings[-1].shape[0]
    if require_pow:
        total = total / norm
    return jnp.reshape(total, (1,))


if __name__ == "__main__":
    key = jax.random.PRNGKey(0)
    k1, k2, k3, k4, k5, k6 = jax.random.split(key, 6)

    # Case 1: canonical BPR usage -- three same-shaped (batch, hidden)
    # embeddings, exercising the fused single-launch path.
    B, D = 8, 32
    user_e = jax.random.normal(k1, (B, D), dtype=jnp.float32)
    pos_e = jax.random.normal(k2, (B, D), dtype=jnp.float32)
    neg_e = jax.random.normal(k3, (B, D), dtype=jnp.float32)

    for require_pow in (False, True):
        out = jax.block_until_ready(
            emb_loss(user_e, pos_e, neg_e, norm=2, require_pow=require_pow))
        ref = jax.block_until_ready(
            emb_loss_ref(user_e, pos_e, neg_e, norm=2, require_pow=require_pow))
        np.testing.assert_allclose(np.asarray(out), np.asarray(ref),
                                   rtol=1e-5, atol=1e-6)

    # Case 2: mixed shapes / dtypes -- exercises grouping, ragged-row masking
    # and the parallel row-block split.
    a = jax.random.normal(k4, (6, 48), dtype=jnp.bfloat16)
    b = jax.random.normal(k5, (6, 48), dtype=jnp.bfloat16)
    c = jax.random.normal(k6, (10, 200), dtype=jnp.float32)
    for require_pow in (False, True):
        out = jax.block_until_ready(
            emb_loss(a, b, c, norm=2, require_pow=require_pow))
        ref = jax.block_until_ready(
            emb_loss_ref(a, b, c, norm=2, require_pow=require_pow))
        np.testing.assert_allclose(np.asarray(out), np.asarray(ref),
                                   rtol=1e-4, atol=1e-5)

    print("KERNEL_OK")
</pallas_src>

<mosaic_0001>
module attributes {stable_mosaic.version = 11 : i64} {
  func.func @kernel(%arg0: i32, %arg1: i32, %arg2: memref<8x128xf32, #tpu.memory_space<vmem>>, %arg3: memref<8x128xf32, #tpu.memory_space<vmem>>, %arg4: memref<8x128xf32, #tpu.memory_space<vmem>>, %arg5: memref<1x8x128xf32, #tpu.memory_space<vmem>>, %arg6: memref<1x8x128xf32, #tpu.memory_space<vmem>>, %arg7: memref<1x8x128xf32, #tpu.memory_space<vmem>>, %arg8: memref<8x128xf32, #tpu.memory_space<vmem>>, %arg9: memref<8x128xf32, #tpu.memory_space<vmem>>, %arg10: memref<8x128xf32, #tpu.memory_space<vmem>>) attributes {dimension_semantics = [#tpu.dimension_semantics<parallel>, #tpu.dimension_semantics<arbitrary>], iteration_bounds = array<i64: 1, 1>, scalar_prefetch = 0 : i64, scratch_operands = 3 : i64, tpu.core_type = #tpu.core_type<tc>, window_params = [{transform_indices = @transform_0, window_bounds = array<i64: 8, 128>}, {transform_indices = @transform_1, window_bounds = array<i64: 8, 128>}, {transform_indices = @transform_2, window_bounds = array<i64: 8, 128>}, {transform_indices = @transform_3, window_bounds = array<i64: 1, 8, 128>}, {transform_indices = @transform_4, window_bounds = array<i64: 1, 8, 128>}, {transform_indices = @transform_5, window_bounds = array<i64: 1, 8, 128>}]} {
    %c0_i32 = arith.constant 0 : i32
    %0 = arith.cmpi eq, %arg1, %c0_i32 : i32
    %1 = arith.extui %0 : i1 to i32
    %c0_i32_0 = arith.constant 0 : i32
    %2 = arith.cmpi ne, %1, %c0_i32_0 : i32
    scf.if %2 {
      %cst_26 = arith.constant 0.000000e+00 : f32
      %36 = vector.broadcast %cst_26 : f32 to vector<8x128xf32>
      %c0_27 = arith.constant 0 : index
      %c0_28 = arith.constant 0 : index
      %37 = vector.load %arg8[%c0_27, %c0_28] : memref<8x128xf32, #tpu.memory_space<vmem>>, vector<8x128xf32>
      tpu.vector_store %arg8[%c0_27, %c0_28], %36 {strides = array<i32>} : memref<8x128xf32, #tpu.memory_space<vmem>>, vector<8x128xf32>,
      %cst_29 = arith.constant 0.000000e+00 : f32
      %38 = vector.broadcast %cst_29 : f32 to vector<8x128xf32>
      %c0_30 = arith.constant 0 : index
      %c0_31 = arith.constant 0 : index
      %39 = vector.load %arg9[%c0_30, %c0_31] : memref<8x128xf32, #tpu.memory_space<vmem>>, vector<8x128xf32>
      tpu.vector_store %arg9[%c0_30, %c0_31], %38 {strides = array<i32>} : memref<8x128xf32, #tpu.memory_space<vmem>>, vector<8x128xf32>,
      %cst_32 = arith.constant 0.000000e+00 : f32
      %40 = vector.broadcast %cst_32 : f32 to vector<8x128xf32>
      %c0_33 = arith.constant 0 : index
      %c0_34 = arith.constant 0 : index
      %41 = vector.load %arg10[%c0_33, %c0_34] : memref<8x128xf32, #tpu.memory_space<vmem>>, vector<8x128xf32>
      tpu.vector_store %arg10[%c0_33, %c0_34], %40 {strides = array<i32>} : memref<8x128xf32, #tpu.memory_space<vmem>>, vector<8x128xf32>,
    } else {
    }
    %cst = arith.constant 0.000000e+00 : f32
    %3 = vector.broadcast %cst : f32 to vector<8x128xf32>
    %c0_i32_1 = arith.constant 0 : i32
    %c8_i32 = arith.constant 8 : i32
    %4 = arith.muli %c0_i32_1, %c8_i32 : i32
    %5 = tpu.assume_multiple %4, 8 : i32
    %6 = arith.index_cast %5 : i32 to index
    %c0 = arith.constant 0 : index
    %7 = vector.load %arg2[%6, %c0] : memref<8x128xf32, #tpu.memory_space<vmem>>, vector<8x128xf32>
    %8 = arith.mulf %7, %7 : vector<8x128xf32>
    %9 = arith.addf %3, %8 : vector<8x128xf32>
    %c1_i32 = arith.constant 1 : i32
    %c0_2 = arith.constant 0 : index
    %c0_3 = arith.constant 0 : index
    %10 = vector.load %arg8[%c0_2, %c0_3] : memref<8x128xf32, #tpu.memory_space<vmem>>, vector<8x128xf32>
    %11 = arith.addf %10, %9 : vector<8x128xf32>
    %c0_4 = arith.constant 0 : index
    %c0_5 = arith.constant 0 : index
    %12 = vector.load %arg8[%c0_4, %c0_5] : memref<8x128xf32, #tpu.memory_space<vmem>>, vector<8x128xf32>
    tpu.vector_store %arg8[%c0_4, %c0_5], %11 {strides = array<i32>} : memref<8x128xf32, #tpu.memory_space<vmem>>, vector<8x128xf32>,
    %cst_6 = arith.constant 0.000000e+00 : f32
    %13 = vector.broadcast %cst_6 : f32 to vector<8x128xf32>
    %c0_i32_7 = arith.constant 0 : i32
    %c8_i32_8 = arith.constant 8 : i32
    %14 = arith.muli %c0_i32_7, %c8_i32_8 : i32
    %15 = tpu.assume_multiple %14, 8 : i32
    %16 = arith.index_cast %15 : i32 to index
    %c0_9 = arith.constant 0 : index
    %17 = vector.load %arg3[%16, %c0_9] : memref<8x128xf32, #tpu.memory_space<vmem>>, vector<8x128xf32>
    %18 = arith.mulf %17, %17 : vector<8x128xf32>
    %19 = arith.addf %13, %18 : vector<8x128xf32>
    %c1_i32_10 = arith.constant 1 : i32
    %c0_11 = arith.constant 0 : index
    %c0_12 = arith.constant 0 : index
    %20 = vector.load %arg9[%c0_11, %c0_12] : memref<8x128xf32, #tpu.memory_space<vmem>>, vector<8x128xf32>
    %21 = arith.addf %20, %19 : vector<8x128xf32>
    %c0_13 = arith.constant 0 : index
    %c0_14 = arith.constant 0 : index
    %22 = vector.load %arg9[%c0_13, %c0_14] : memref<8x128xf32, #tpu.memory_space<vmem>>, vector<8x128xf32>
    tpu.vector_store %arg9[%c0_13, %c0_14], %21 {strides = array<i32>} : memref<8x128xf32, #tpu.memory_space<vmem>>, vector<8x128xf32>,
    %cst_15 = arith.constant 0.000000e+00 : f32
    %23 = vector.broadcast %cst_15 : f32 to vector<8x128xf32>
    %c0_i32_16 = arith.constant 0 : i32
    %c8_i32_17 = arith.constant 8 : i32
    %24 = arith.muli %c0_i32_16, %c8_i32_17 : i32
    %25 = tpu.assume_multiple %24, 8 : i32
    %26 = arith.index_cast %25 : i32 to index
    %c0_18 = arith.constant 0 : index
    %27 = vector.load %arg4[%26, %c0_18] : memref<8x128xf32, #tpu.memory_space<vmem>>, vector<8x128xf32>
    %28 = arith.mulf %27, %27 : vector<8x128xf32>
    %29 = arith.addf %23, %28 : vector<8x128xf32>
    %c1_i32_19 = arith.constant 1 : i32
    %c0_20 = arith.constant 0 : index
    %c0_21 = arith.constant 0 : index
    %30 = vector.load %arg10[%c0_20, %c0_21] : memref<8x128xf32, #tpu.memory_space<vmem>>, vector<8x128xf32>
    %31 = arith.addf %30, %29 : vector<8x128xf32>
    %c0_22 = arith.constant 0 : index
    %c0_23 = arith.constant 0 : index
    %32 = vector.load %arg10[%c0_22, %c0_23] : memref<8x128xf32, #tpu.memory_space<vmem>>, vector<8x128xf32>
    tpu.vector_store %arg10[%c0_22, %c0_23], %31 {strides = array<i32>} : memref<8x128xf32, #tpu.memory_space<vmem>>, vector<8x128xf32>,
    %c0_i32_24 = arith.constant 0 : i32
    %33 = arith.cmpi eq, %arg1, %c0_i32_24 : i32
    %34 = arith.extui %33 : i1 to i32
    %c0_i32_25 = arith.constant 0 : i32
    %35 = arith.cmpi ne, %34, %c0_i32_25 : i32
    scf.if %35 {
      %c0_26 = arith.constant 0 : index
      %c0_27 = arith.constant 0 : index
      %36 = vector.load %arg8[%c0_26, %c0_27] : memref<8x128xf32, #tpu.memory_space<vmem>>, vector<8x128xf32>
      %37 = vector.shape_cast %36 : vector<8x128xf32> to vector<1x8x128xf32>
      %cst_28 = arith.constant dense<0.000000e+00> : vector<1xf32>
      %38 = vector.multi_reduction <add>, %37, %cst_28 [1, 2] : vector<1x8x128xf32> to vector<1xf32>
      %39 = vector.shape_cast %38 : vector<1xf32> to vector<1x1x1xf32>
      %40 = vector.extract %39[0, 0, 0] : f32 from vector<1x1x1xf32>
      %41 = vector.broadcast %40 : f32 to vector<1x8x128xf32>
      %c0_29 = arith.constant 0 : index
      %c0_30 = arith.constant 0 : index
      %c0_31 = arith.constant 0 : index
      %42 = vector.load %arg5[%c0_29, %c0_30, %c0_31] : memref<1x8x128xf32, #tpu.memory_space<vmem>>, vector<1x8x128xf32>
      tpu.vector_store %arg5[%c0_29, %c0_30, %c0_31], %41 {strides = array<i32>} : memref<1x8x128xf32, #tpu.memory_space<vmem>>, vector<1x8x128xf32>,
      %c0_32 = arith.constant 0 : index
      %c0_33 = arith.constant 0 : index
      %43 = vector.load %arg9[%c0_32, %c0_33] : memref<8x128xf32, #tpu.memory_space<vmem>>, vector<8x128xf32>
      %44 = vector.shape_cast %43 : vector<8x128xf32> to vector<1x8x128xf32>
      %cst_34 = arith.constant dense<0.000000e+00> : vector<1xf32>
      %45 = vector.multi_reduction <add>, %44, %cst_34 [1, 2] : vector<1x8x128xf32> to vector<1xf32>
      %46 = vector.shape_cast %45 : vector<1xf32> to vector<1x1x1xf32>
      %47 = vector.extract %46[0, 0, 0] : f32 from vector<1x1x1xf32>
      %48 = vector.broadcast %47 : f32 to vector<1x8x128xf32>
      %c0_35 = arith.constant 0 : index
      %c0_36 = arith.constant 0 : index
      %c0_37 = arith.constant 0 : index
      %49 = vector.load %arg6[%c0_35, %c0_36, %c0_37] : memref<1x8x128xf32, #tpu.memory_space<vmem>>, vector<1x8x128xf32>
      tpu.vector_store %arg6[%c0_35, %c0_36, %c0_37], %48 {strides = array<i32>} : memref<1x8x128xf32, #tpu.memory_space<vmem>>, vector<1x8x128xf32>,
      %c0_38 = arith.constant 0 : index
      %c0_39 = arith.constant 0 : index
      %50 = vector.load %arg10[%c0_38, %c0_39] : memref<8x128xf32, #tpu.memory_space<vmem>>, vector<8x128xf32>
      %51 = vector.shape_cast %50 : vector<8x128xf32> to vector<1x8x128xf32>
      %cst_40 = arith.constant dense<0.000000e+00> : vector<1xf32>
      %52 = vector.multi_reduction <add>, %51, %cst_40 [1, 2] : vector<1x8x128xf32> to vector<1xf32>
      %53 = vector.shape_cast %52 : vector<1xf32> to vector<1x1x1xf32>
      %54 = vector.extract %53[0, 0, 0] : f32 from vector<1x1x1xf32>
      %55 = vector.broadcast %54 : f32 to vector<1x8x128xf32>
      %c0_41 = arith.constant 0 : index
      %c0_42 = arith.constant 0 : index
      %c0_43 = arith.constant 0 : index
      %56 = vector.load %arg7[%c0_41, %c0_42, %c0_43] : memref<1x8x128xf32, #tpu.memory_space<vmem>>, vector<1x8x128xf32>
      tpu.vector_store %arg7[%c0_41, %c0_42, %c0_43], %55 {strides = array<i32>} : memref<1x8x128xf32, #tpu.memory_space<vmem>>, vector<1x8x128xf32>,
    } else {
    }
    return
  }
  func.func @transform_0(%arg0: i32, %arg1: i32) -> (i32, i32) {
    %c1_i32 = arith.constant 1 : i32
    %0 = arith.muli %arg0, %c1_i32 : i32
    %1 = arith.addi %0, %arg1 : i32
    %c0_i32 = arith.constant 0 : i32
    %c0_i32_0 = arith.constant 0 : i32
    return %1, %c0_i32 : i32, i32
  }
  func.func @transform_1(%arg0: i32, %arg1: i32) -> (i32, i32) {
    %c1_i32 = arith.constant 1 : i32
    %0 = arith.muli %arg0, %c1_i32 : i32
    %1 = arith.addi %0, %arg1 : i32
    %c0_i32 = arith.constant 0 : i32
    %c0_i32_0 = arith.constant 0 : i32
    return %1, %c0_i32 : i32, i32
  }
  func.func @transform_2(%arg0: i32, %arg1: i32) -> (i32, i32) {
    %c1_i32 = arith.constant 1 : i32
    %0 = arith.muli %arg0, %c1_i32 : i32
    %1 = arith.addi %0, %arg1 : i32
    %c0_i32 = arith.constant 0 : i32
    %c0_i32_0 = arith.constant 0 : i32
    return %1, %c0_i32 : i32, i32
  }
  func.func @transform_3(%arg0: i32, %arg1: i32) -> (i32, i32, i32) {
    %c0_i32 = arith.constant 0 : i32
    %c0_i32_0 = arith.constant 0 : i32
    %c0_i32_1 = arith.constant 0 : i32
    return %arg0, %c0_i32, %c0_i32_0 : i32, i32, i32
  }
  func.func @transform_4(%arg0: i32, %arg1: i32) -> (i32, i32, i32) {
    %c0_i32 = arith.constant 0 : i32
    %c0_i32_0 = arith.constant 0 : i32
    %c0_i32_1 = arith.constant 0 : i32
    return %arg0, %c0_i32, %c0_i32_0 : i32, i32, i32
  }
  func.func @transform_5(%arg0: i32, %arg1: i32) -> (i32, i32, i32) {
    %c0_i32 = arith.constant 0 : i32
    %c0_i32_0 = arith.constant 0 : i32
    %c0_i32_1 = arith.constant 0 : i32
    return %arg0, %c0_i32, %c0_i32_0 : i32, i32, i32
  }
}

</mosaic_0001>

<bundles_post_ra>
// kernel: tpu_custom_call.1
= control target key start
LH: loop header
LB: loop body
LE: loop exit
PB: predicated region body
PF: predicated region fallthrough
CT: control target
= control target key end

     0   :  { %11 = vsyncpa [#allocation6], 0  ;;  %s440_s0 = inlined_call_operand.hbm [shape: f32[8,128], index: 0, kind: input, shape index: {}]   ;;  %s441_s1 = inlined_call_operand.hbm [shape: f32[8,128], index: 1, kind: input, shape index: {}]   ;;  %s442_s2 = inlined_call_operand.hbm [shape: f32[8,128], index: 2, kind: input, shape index: {}]   ;;  %s443_s3 = inlined_call_operand.hbm [shape: f32[1,8,128], index: 3, kind: output, shape index: {0}]   ;;  %s444_s4 = inlined_call_operand.hbm [shape: f32[1,8,128], index: 4, kind: output, shape index: {1}]   ;;  %s445_s5 = inlined_call_operand.hbm [shape: f32[1,8,128], index: 5, kind: output, shape index: {2}]  }
   0x1   :  { %12 = vsyncpa [#allocation9], 0 }
   0x2   :  { %13 = vsyncpa [#allocation7], 0 }
   0x3   :  { %14 = vsyncpa [#allocation13], 0  ;;  %s325_s18 = smov [#allocation8]   ;;  %s326_s20 = smov [#allocation5]  }
   0x4   :  { %s37_s19 = sshll.u32 %s325_s18, 4  ;;  %s24_s21 = sshll.u32 %s326_s20, 4  ;;  %s38_s19 = int_to_ptr.vmem [resolvable:$true] %s37_s19  ;;  %s25_s21 = int_to_ptr.vmem [resolvable:$true] %s24_s21 }
   0x5   :  { %s185_s24 = scalar_lea.hbm %s441_s1, 128 }
   0x6   :  { %p186_p0 = scmp.ne.s32.totalorder %s441_s1, %s185_s24  ;;  %p189_p1 = scmp.lt.u32.totalorder %s185_s24, %s441_s1 }
   0x8   :  { %p191_p2 = pnand %p189_p1, %p186_p0 }
   0xa   :  { %194 = shalt.err (!%p191_p2)
}
   0xb   :  { %s195_s29 = scalar_lea.vmem %s38_s19, 128  ;;  %p200_p4 = scmp.lt.s32.totalorder %s38_s19, %s38_s19 }
   0xc   :  { %p196_p3 = scmp.ne.s32.totalorder %s38_s19, %s195_s29  ;;  %p201_p5 = scmp.lt.s32.totalorder %s195_s29, %s195_s29 }
   0xe   :  { %p202_p6 = por %p201_p5, %p200_p4 }
  0x10   :  { %p203_p7 = pnand %p202_p6, %p196_p3 }
  0x12   :  { %206 = shalt.err (!%p203_p7)
}
  0x13   :  { %40 = dma.hbm_to_vmem [thread:$0]  %s441_s1, 128, %s38_s19, [#allocation9]  }
  0x14   :  { %s207_s9 = scalar_lea.hbm %s440_s0, 128 }
  0x15   :  { %p208_p8 = scmp.ne.s32.totalorder %s440_s0, %s207_s9  ;;  %p211_p9 = scmp.lt.u32.totalorder %s207_s9, %s440_s0 }
  0x17   :  { %p213_p10 = pnand %p211_p9, %p208_p8 }
  0x19   :  { %216 = shalt.err (!%p213_p10)
}
  0x1a   :  { %s217_s14 = scalar_lea.vmem %s25_s21, 128  ;;  %p222_p12 = scmp.lt.s32.totalorder %s25_s21, %s25_s21 }
  0x1b   :  { %p218_p11 = scmp.ne.s32.totalorder %s25_s21, %s217_s14  ;;  %p223_p13 = scmp.lt.s32.totalorder %s217_s14, %s217_s14 }
  0x1d   :  { %p224_p0 = por %p223_p13, %p222_p12 }
  0x1f   :  { %p225_p1 = pnand %p224_p0, %p218_p11 }
  0x21   :  { %228 = shalt.err (!%p225_p1)
}
  0x22   :  { %27 = dma.hbm_to_vmem [thread:$0]  %s440_s0, 128, %s25_s21, [#allocation6]  }
  0x23   :  { %s327_s16 = smov [#allocation10]   ;;  %s229_s20 = scalar_lea.hbm %s442_s2, 128 }
  0x24   :  { %s50_s17 = sshll.u32 %s327_s16, 4  ;;  %p230_p2 = scmp.ne.s32.totalorder %s442_s2, %s229_s20  ;;  %s51_s17 = int_to_ptr.vmem [resolvable:$true] %s50_s17 }
  0x25   :  { %p233_p3 = scmp.lt.u32.totalorder %s229_s20, %s442_s2 }
  0x27   :  { %p235_p4 = pnand %p233_p3, %p230_p2 }
  0x29   :  { %238 = shalt.err (!%p235_p4)
}
  0x2a   :  { %s239_s26 = scalar_lea.vmem %s51_s17, 128  ;;  %p244_p6 = scmp.lt.s32.totalorder %s51_s17, %s51_s17 }
  0x2b   :  { %p240_p5 = scmp.ne.s32.totalorder %s51_s17, %s239_s26  ;;  %p245_p7 = scmp.lt.s32.totalorder %s239_s26, %s239_s26 }
  0x2d   :  { %p246_p8 = por %p245_p7, %p244_p6 }
  0x2f   :  { %p247_p9 = pnand %p246_p8, %p240_p5 }
  0x31   :  { %250 = shalt.err (!%p247_p9)
}
  0x32   :  { %53 = dma.hbm_to_vmem [thread:$0]  %s442_s2, 128, %s51_s17, [#allocation9]  }
  0x33   :  { %317 = dma.done.wait [#allocation6], 128  }
  0x34   :  { %318 = vsyncadd [#allocation6], 4294967168 }
  0x35   :  { %319 = dma.done.wait [#allocation9], 256  }
  0x36   :  { %320 = vsyncadd [#allocation9], 4294967040  ;;  %v85_v0 = vld [vmem:[#allocation10] sm:$0xff]  ;;  %v73_v1 = vld [vmem:[#allocation5] sm:$0xff]  ;;  %s328_s2 = smov [#allocation11]   ;;  %s329_s29 = smov [#allocation12]  }
  0x37   :  { %v79_v2 = vld [vmem:[#allocation8] sm:$0xff]  ;;  %v86_v3 = vmul.f32 %v85_v0, %v85_v0  ;;  %v74_v4 = vmul.f32 %v73_v1, %v73_v1  ;;  %s136_s27 = sshll.u32 %s328_s2, 4  ;;  %s146_s30 = sshll.u32 %s329_s29, 4  ;;  %s137_s27 = int_to_ptr.vmem [resolvable:$true] %s136_s27  ;;  %s147_s30 = int_to_ptr.vmem [resolvable:$true] %s146_s30 }
  0x38   :  { %v80_v5 = vmul.f32 %v79_v2, %v79_v2  ;;  %s330_s6 = smov [#allocation14]   ;;  %s251_s8 = scalar_lea.vmem %s137_s27, 128 }
  0x39   :  { %119 = vadd.xlane.f32.xlu1 %v86_v3  ;;  %95 = vadd.xlane.f32.xlu0 %v74_v4  ;;  %s156_s7 = sshll.u32 %s330_s6, 4  ;;  %p252_p10 = scmp.ne.s32.totalorder %s137_s27, %s251_s8  ;;  %s409_s7 = int_to_ptr.vmem [resolvable:$true] %s156_s7 }
  0x3a   :  { %p256_p11 = scmp.lt.s32.totalorder %s137_s27, %s137_s27  ;;  %p257_p12 = scmp.lt.s32.totalorder %s251_s8, %s251_s8 }
  0x3c   :  { %p258_p13 = por %p257_p12, %p256_p11 }
  0x3d   :  { %107 = vadd.xlane.f32.xlu0 %v80_v5 }
  0x3e   :  { %p259_p0 = pnand %p258_p13, %p252_p10 }
  0xc6   :  { %v120_v6 = vpop.xlane.xlu1 %119  ;;  %v96_v7 = vpop.xlane.xlu0 %95 }
  0xc7   :  { %v121_v8 = vrot.slane %v120_v6, 4  ;;  %v97_v9 = vrot.slane %v96_v7, 4 }
  0xc9   :  { %v122_v10 = vadd.f32 %v121_v8, %v120_v6  ;;  %v98_v11 = vadd.f32 %v97_v9, %v96_v7 }
  0xca   :  { %v108_v12 = vpop.xlane.xlu0 %107 }
  0xcb   :  { %v123_v13 = vrot.slane %v122_v10, 2  ;;  %v99_v14 = vrot.slane %v98_v11, 2  ;;  %v109_v15 = vrot.slane %v108_v12, 4 }
  0xcd   :  { %v110_v16 = vadd.f32 %v109_v15, %v108_v12  ;;  %v100_v17 = vadd.f32 %v99_v14, %v98_v11  ;;  %v124_v18 = vadd.f32 %v123_v13, %v122_v10 }
  0xcf   :  { %v111_v19 = vrot.slane %v110_v16, 2  ;;  %v101_v20 = vrot.slane %v100_v17, 1  ;;  %v125_v23 = vrot.slane %v124_v18, 1 }
  0xd1   :  { %v112_v21 = vadd.f32 %v111_v19, %v110_v16  ;;  %v102_v22 = vadd.f32 %v101_v20, %v100_v17  ;;  %v126_v26 = vadd.f32 %v125_v23, %v124_v18 }
  0xd3   :  { %173 = vpush %v102_v22  ;;  %v113_v24 = vrot.slane %v112_v21, 1 }
  0xd5   :  { %v114_v25 = vadd.f32 %v113_v24, %v112_v21 }
  0xd7   :  { %175 = vpush %v114_v25 }
  0xd8   :  { %177 = vpush %v126_v26 }
 0x104   :  { %s174_s28 = spop %173 }
 0x105   :  { %v104_v27 = vstv %s174_s28 }
 0x106   :  { %105 = vst [vmem:[#allocation11] sm:$0xff] %v104_v27 }
 0x107   :  { %262 = shalt.err (!%p259_p0)
}
 0x108   :  { %s263_s11 = scalar_lea.hbm %s443_s3, 128 }
 0x109   :  { %p264_p1 = scmp.ne.s32.totalorder %s443_s3, %s263_s11  ;;  %p267_p2 = scmp.lt.u32.totalorder %s263_s11, %s443_s3 }
 0x10b   :  { %p269_p3 = pnand %p267_p2, %p264_p1 }
 0x10d   :  { %272 = shalt.err (!%p269_p3)
}
 0x10e   :  { %139 = dma.vmem_to_hbm [thread:$0]  %s137_s27, 128, %s443_s3, [#allocation7]  }
 0x10f   :  { %s176_s17 = spop %175  ;;  %s273_s19 = scalar_lea.vmem %s147_s30, 128 }
 0x110   :  { %v116_v28 = vstv %s176_s17  ;;  %s178_s18 = spop %177  ;;  %p274_p4 = scmp.ne.s32.totalorder %s147_s30, %s273_s19 }
 0x111   :  { %117 = vst [vmem:[#allocation12] sm:$0xff] %v116_v28  ;;  %v128_v29 = vstv %s178_s18  ;;  %p278_p5 = scmp.lt.s32.totalorder %s147_s30, %s147_s30  ;;  %p279_p6 = scmp.lt.s32.totalorder %s273_s19, %s273_s19 }
 0x112   :  { %129 = vst [vmem:[#allocation14] sm:$0xff] %v128_v29 }
 0x113   :  { %p280_p7 = por %p279_p6, %p278_p5 }
 0x115   :  { %p281_p8 = pnand %p280_p7, %p274_p4 }
 0x117   :  { %284 = shalt.err (!%p281_p8)
}
 0x118   :  { %s285_s3 = scalar_lea.hbm %s444_s4, 128 }
 0x119   :  { %p286_p9 = scmp.ne.s32.totalorder %s444_s4, %s285_s3  ;;  %p289_p10 = scmp.lt.u32.totalorder %s285_s3, %s444_s4 }
 0x11b   :  { %p291_p11 = pnand %p289_p10, %p286_p9 }
 0x11d   :  { %294 = shalt.err (!%p291_p11)
}
 0x11e   :  { %149 = dma.vmem_to_hbm [thread:$0]  %s147_s30, 128, %s444_s4, [#allocation13]  }
 0x11f   :  { %s295_s2 = scalar_lea.vmem %s409_s7, 128  ;;  %p300_p13 = scmp.lt.s32.totalorder %s409_s7, %s409_s7 }
 0x120   :  { %p296_p12 = scmp.ne.s32.totalorder %s409_s7, %s295_s2  ;;  %p301_p0 = scmp.lt.s32.totalorder %s295_s2, %s295_s2 }
 0x122   :  { %p302_p1 = por %p301_p0, %p300_p13 }
 0x124   :  { %p303_p2 = pnand %p302_p1, %p296_p12 }
 0x126   :  { %306 = shalt.err (!%p303_p2)
}
 0x127   :  { %s307_s29 = scalar_lea.hbm %s445_s5, 128 }
 0x128   :  { %p308_p3 = scmp.ne.s32.totalorder %s445_s5, %s307_s29  ;;  %p311_p4 = scmp.lt.u32.totalorder %s307_s29, %s445_s5 }
 0x12a   :  { %p313_p5 = pnand %p311_p4, %p308_p3 }
 0x12c   :  { %316 = shalt.err (!%p313_p5)
}
 0x12d   :  { %159 = dma.vmem_to_hbm [thread:$0]  %s409_s7, 128, %s445_s5, [#allocation13]  }
 0x12e   :  { %321 = dma.done.wait [#allocation7], 128  }
 0x12f   :  { %322 = vsyncadd [#allocation7], 4294967168 }
 0x130   :  { %323 = dma.done.wait [#allocation13], 256  }
 0x131   :  { %324 = vsyncadd [#allocation13], 4294967040 }
 0x132   :  { %169 = vsyncpa [#allocation6], 1 }
 0x133   :  { %170 = vsyncpa [#allocation9], 1 }
 0x134   :  { %171 = vsyncpa [#allocation7], 1 }
 0x135   :  { %172 = vsyncpa [#allocation13], 1 }

</bundles_post_ra>
